<compile_context>
chip_gen: v6e
topology: v6e:2x2x1
jax: 0.10.0
libtpu: 0.0.40
codegen_flags: <defaults>
</compile_context>

<pallas_src>
import functools
import math

import jax
import jax.numpy as jnp
from jax import lax
from jax.experimental import pallas as pl
from jax.experimental.pallas import tpu as pltpu


def _cdiv(a, b):
    return -(-a // b)


def _round_up(a, m):
    return _cdiv(a, m) * m


# ---------------------------------------------------------------------------
# Regime A: small images -> fold a tile of batch elements into each block.
# ---------------------------------------------------------------------------
def _nll_kernel_batched(x_ref, t_ref, o_ref, *, n, tile_n):
    x = x_ref[...]                                        # (TILE_N, C, HW) probabilities
    t = t_ref[...]                                        # (TILE_N, 1, HW) class indices

    cls = lax.broadcasted_iota(jnp.int32, x.shape, 1)
    sel = jnp.where(cls == t, x, jnp.zeros((), x.dtype))  # keep x's dtype (bf16 ok)
    picked = jnp.sum(sel, axis=1)                         # (TILE_N, HW); exact (1 nonzero term)
    logp = jnp.log(picked.astype(jnp.float32))            # one log per pixel, in f32

    if n % tile_n != 0:                                   # ragged last batch tile (compile-time)
        row = pl.program_id(0) * tile_n + lax.broadcasted_iota(
            jnp.int32, (tile_n, 1), 0)
        logp = jnp.where(row < n, logp, 0.0)

    # Per-lane partial sums over the batch rows of this tile; cross-lane reduce is
    # deferred to the wrapper epilogue.
    o_ref[...] = jnp.sum(logp, axis=0, keepdims=True)     # (1, HW)


def _log_nll_batched(x3, t3, n, c, hw, itemsize, budget_bytes, vmem_limit_bytes):
    hwp = _round_up(hw, 128)
    c_pad = _round_up(c, 8)
    # Per-batch-element VMEM cost: double-buffered x block + double-buffered int32
    # targets (8-sublane padded).
    per_elem = 2 * hwp * (c_pad * itemsize + 8 * 4)
    tile_n = max(1, min(n, budget_bytes // per_elem))
    grid_n = _cdiv(n, tile_n)
    if grid_n == 1 and n > 1:
        # Expose >= 2 parallel grid steps so v7x's second TensorCore gets work.
        tile_n = _cdiv(n, 2)
        grid_n = _cdiv(n, tile_n)

    kernel = functools.partial(_nll_kernel_batched, n=n, tile_n=tile_n)

    partial = pl.pallas_call(
        kernel,
        out_shape=jax.ShapeDtypeStruct((grid_n, 1, hw), jnp.float32),
        grid_spec=pltpu.PrefetchScalarGridSpec(
            num_scalar_prefetch=0,
            grid=(grid_n,),
            in_specs=[
                pl.BlockSpec((tile_n, c, hw), lambda b: (b, 0, 0)),
                pl.BlockSpec((tile_n, 1, hw), lambda b: (b, 0, 0)),
            ],
            out_specs=pl.BlockSpec((None, 1, hw), lambda b: (b, 0, 0)),
        ),
        compiler_params=pltpu.CompilerParams(
            dimension_semantics=("parallel",),
            vmem_limit_bytes=vmem_limit_bytes,
        ),
    )(x3, t3)
    return jnp.sum(partial)


# ---------------------------------------------------------------------------
# Regime B: large images -> per-batch, 128-aligned pixel tiles.
# ---------------------------------------------------------------------------
def _nll_kernel_tiled(x_ref, t_ref, o_ref, *, hw, tile_p, inner_p, last_tile):
    s = pl.program_id(1)
    p = pl.program_id(2)

    @pl.when(p == 0)
    def _():
        o_ref[...] = jnp.zeros_like(o_ref)

    x = x_ref[...]                                        # (C, TILE_P) probabilities
    t = t_ref[...]                                        # (1, TILE_P) class indices

    cls = lax.broadcasted_iota(jnp.int32, x.shape, 0)
    sel = jnp.where(cls == t, x, jnp.zeros((), x.dtype))  # keep x's dtype (bf16 ok)
    picked = jnp.sum(sel, axis=0, keepdims=True)          # (1, TILE_P); exact (1 nonzero term)
    logp = jnp.log(picked.astype(jnp.float32))            # one log per pixel, in f32

    # TODO(synk): on v7x a per-tile XLU cross-lane reduce into a small scratch
    # accumulator (instead of the full-width RMW below) would cut vld/vst pressure.
    if hw % tile_p == 0:
        o_ref[...] += logp
    else:
        g = s * inner_p + p                               # global pixel-tile index

        @pl.when(g != last_tile)
        def _():
            o_ref[...] += logp

        @pl.when(g == last_tile)                          # ragged tail: mask only here
        def _():
            pix = g * tile_p + lax.broadcasted_iota(jnp.int32, (1, tile_p), 1)
            o_ref[...] += jnp.where(pix < hw, logp, 0.0)


def _log_nll_tiled(x3, t3, n, c, hw, itemsize, budget_bytes, max_x_block_bytes,
                   vmem_limit_bytes):
    c_pad = _round_up(c, 8)
    # VMEM bytes per pixel column: double-buffered x block + double-buffered int32
    # targets row (8x sublane-padded) + (conservatively 2x) resident f32 output row
    # (also 8x sublane-padded).
    per_pixel = 2 * c_pad * itemsize + 2 * 8 * 4 + 2 * 8 * 4
    cap = min(budget_bytes // per_pixel, max_x_block_bytes // (c_pad * itemsize))
    cap = max(128, (cap // 128) * 128)

    if cap >= hw:
        tile_p = hw                                       # single full-extent pixel tile
    else:
        tile_p = cap                                      # 128-aligned; tail handled by mask
    grid_p = _cdiv(hw, tile_p)

    n_splits = 1
    if n == 1 and grid_p >= 4 and grid_p % 2 == 0:
        n_splits = 2                                      # keep both v7x TensorCores busy
    inner_p = grid_p // n_splits

    kernel = functools.partial(_nll_kernel_tiled, hw=hw, tile_p=tile_p,
                               inner_p=inner_p, last_tile=grid_p - 1)

    partial = pl.pallas_call(
        kernel,
        out_shape=jax.ShapeDtypeStruct((n, n_splits, 1, tile_p), jnp.float32),
        grid_spec=pltpu.PrefetchScalarGridSpec(
            num_scalar_prefetch=0,
            grid=(n, n_splits, inner_p),
            in_specs=[
                pl.BlockSpec((None, c, tile_p),
                             lambda b, s, p: (b, 0, s * inner_p + p)),
                pl.BlockSpec((None, 1, tile_p),
                             lambda b, s, p: (b, 0, s * inner_p + p)),
            ],
            out_specs=pl.BlockSpec((None, None, 1, tile_p),
                                   lambda b, s, p: (b, s, 0, 0)),
        ),
        compiler_params=pltpu.CompilerParams(
            dimension_semantics=("parallel", "parallel", "arbitrary"),
            vmem_limit_bytes=vmem_limit_bytes,
        ),
    )(x3, t3)
    return jnp.sum(partial)


def log_nll_loss(x, targets, *,
                 batched_threshold_bytes=1 << 20,
                 block_budget_bytes=8 << 20,
                 max_x_block_bytes=2 << 20,
                 vmem_limit_bytes=32 << 20):
    """x: (N, C, H, W) probabilities; targets: (N, H, W) int class indices."""
    n, c = x.shape[0], x.shape[1]
    hw = int(math.prod(x.shape[2:])) if x.ndim > 2 else 1

    x3 = x.reshape(n, c, hw)                              # pure reshape, no transpose/copy
    t3 = targets.reshape(n, 1, hw).astype(jnp.int32)
    itemsize = x3.dtype.itemsize

    one_image_bytes = _round_up(c, 8) * _round_up(hw, 128) * itemsize
    if one_image_bytes <= batched_threshold_bytes:
        total = _log_nll_batched(x3, t3, n, c, hw, itemsize,
                                 block_budget_bytes, vmem_limit_bytes)
    else:
        total = _log_nll_tiled(x3, t3, n, c, hw, itemsize,
                               block_budget_bytes, max_x_block_bytes,
                               vmem_limit_bytes)

    # TODO(synk): torch.nn.NLLLoss ignore_index (default -100) is not modeled; all
    # pixels are assumed to carry valid class indices in [0, C).
    return -(total / jnp.float32(n * hw))


if __name__ == "__main__":
    key = jax.random.PRNGKey(0)
    kx, kt = jax.random.split(key)

    def ref_loss(x, targets):
        log_x = jnp.log(x)
        gathered = jnp.take_along_axis(log_x, targets[:, None, :, :], axis=1)
        return -jnp.mean(gathered)

    # 1) Default path: small image -> batch-folded blocks (Regime A).
    N, C, H, W = 2, 4, 16, 16
    logits = jax.random.normal(kx, (N, C, H, W), dtype=jnp.float32)
    x = jax.nn.softmax(logits, axis=1)                    # valid probabilities
    targets = jax.random.randint(kt, (N, H, W), 0, C, dtype=jnp.int32)
    loss = log_nll_loss(x, targets)
    jax.block_until_ready(loss)
    ref = ref_loss(x, targets)
    assert jnp.allclose(loss, ref, atol=1e-5, rtol=1e-5), (loss, ref)

    # 2) Pixel-tiled path with a ragged tail (Regime B, masked last tile),
    #    forced by shrinking the block budgets.
    N2, C2, H2, W2 = 2, 5, 24, 24                          # hw=576 -> 512-pixel tiles + tail
    logits2 = jax.random.normal(kx, (N2, C2, H2, W2), dtype=jnp.float32)
    x2 = jax.nn.softmax(logits2, axis=1)
    targets2 = jax.random.randint(kt, (N2, H2, W2), 0, C2, dtype=jnp.int32)
    loss2 = log_nll_loss(x2, targets2,
                         batched_threshold_bytes=0,
                         block_budget_bytes=1 << 16,
                         max_x_block_bytes=1 << 14)
    jax.block_until_ready(loss2)
    ref2 = ref_loss(x2, targets2)
    assert jnp.allclose(loss2, ref2, atol=1e-5, rtol=1e-5), (loss2, ref2)

    # 3) Pixel-tiled path with N == 1 -> parallel split of the pixel tiles.
    N3, C3, H3, W3 = 1, 4, 32, 32                          # hw=1024 -> 8 tiles of 128, 2 splits
    logits3 = jax.random.normal(kx, (N3, C3, H3, W3), dtype=jnp.float32)
    x3 = jax.nn.softmax(logits3, axis=1)
    targets3 = jax.random.randint(kt, (N3, H3, W3), 0, C3, dtype=jnp.int32)
    loss3 = log_nll_loss(x3, targets3,
                         batched_threshold_bytes=0,
                         block_budget_bytes=1 << 16,
                         max_x_block_bytes=1 << 12)
    jax.block_until_ready(loss3)
    ref3 = ref_loss(x3, targets3)
    assert jnp.allclose(loss3, ref3, atol=1e-5, rtol=1e-5), (loss3, ref3)

    print("KERNEL_OK")
</pallas_src>

<mosaic_0001>
module attributes {stable_mosaic.version = 11 : i64} {
  func.func @_nll_kernel_batched(%arg0: i32, %arg1: memref<1x4x256xf32, #tpu.memory_space<vmem>>, %arg2: memref<1x1x256xi32, #tpu.memory_space<vmem>>, %arg3: memref<1x1x256xf32, #tpu.memory_space<vmem>>) attributes {dimension_semantics = [#tpu.dimension_semantics<parallel>], iteration_bounds = array<i64: 2>, scalar_prefetch = 0 : i64, scratch_operands = 0 : i64, tpu.core_type = #tpu.core_type<tc>, window_params = [{transform_indices = @transform_0, window_bounds = array<i64: 1, 4, 256>}, {transform_indices = @transform_1, window_bounds = array<i64: 1, 1, 256>}, {transform_indices = @transform_2, window_bounds = array<i64: 1, 1, 256>}]} {
    %c0 = arith.constant 0 : index
    %c0_0 = arith.constant 0 : index
    %c0_1 = arith.constant 0 : index
    %0 = vector.load %arg1[%c0, %c0_0, %c0_1] : memref<1x4x256xf32, #tpu.memory_space<vmem>>, vector<1x4x256xf32>
    %c0_2 = arith.constant 0 : index
    %c0_3 = arith.constant 0 : index
    %c0_4 = arith.constant 0 : index
    %1 = vector.load %arg2[%c0_2, %c0_3, %c0_4] : memref<1x1x256xi32, #tpu.memory_space<vmem>>, vector<1x1x256xi32>
    %2 = tpu.iota {dimensions = array<i32: 1>} : vector<1x4x256xi32>
    %3 = vector.broadcast %1 : vector<1x1x256xi32> to vector<1x4x256xi32>
    %4 = arith.cmpi eq, %2, %3 : vector<1x4x256xi32>
    %cst = arith.constant 0.000000e+00 : f32
    %5 = vector.broadcast %cst : f32 to vector<1x4x256xf32>
    %6 = arith.select %4, %0, %5 : vector<1x4x256xi1>, vector<1x4x256xf32>
    %cst_5 = arith.constant dense<0.000000e+00> : vector<1x256xf32>
    %7 = vector.multi_reduction <add>, %6, %cst_5 [1] : vector<1x4x256xf32> to vector<1x256xf32>
    %8 = math.log %7 : vector<1x256xf32>
    %cst_6 = arith.constant dense<0.000000e+00> : vector<256xf32>
    %9 = vector.multi_reduction <add>, %8, %cst_6 [0] : vector<1x256xf32> to vector<256xf32>
    %10 = vector.shape_cast %9 : vector<256xf32> to vector<1x256xf32>
    %c0_7 = arith.constant 0 : index
    %c0_8 = arith.constant 0 : index
    %c0_9 = arith.constant 0 : index
    %11 = vector.load %arg3[%c0_7, %c0_8, %c0_9] : memref<1x1x256xf32, #tpu.memory_space<vmem>>, vector<1x1x256xf32>
    %12 = vector.shape_cast %11 : vector<1x1x256xf32> to vector<1x256xf32>
    %13 = vector.shape_cast %10 : vector<1x256xf32> to vector<1x1x256xf32>
    tpu.vector_store %arg3[%c0_7, %c0_8, %c0_9], %13 {strides = array<i32>} : memref<1x1x256xf32, #tpu.memory_space<vmem>>, vector<1x1x256xf32>,
    return
  }
  func.func @transform_0(%arg0: i32) -> (i32, i32, i32) {
    %c0_i32 = arith.constant 0 : i32
    %c0_i32_0 = arith.constant 0 : i32
    %c0_i32_1 = arith.constant 0 : i32
    return %arg0, %c0_i32, %c0_i32_0 : i32, i32, i32
  }
  func.func @transform_1(%arg0: i32) -> (i32, i32, i32) {
    %c0_i32 = arith.constant 0 : i32
    %c0_i32_0 = arith.constant 0 : i32
    %c0_i32_1 = arith.constant 0 : i32
    return %arg0, %c0_i32, %c0_i32_0 : i32, i32, i32
  }
  func.func @transform_2(%arg0: i32) -> (i32, i32, i32) {
    %c0_i32 = arith.constant 0 : i32
    %c0_i32_0 = arith.constant 0 : i32
    %c0_i32_1 = arith.constant 0 : i32
    return %arg0, %c0_i32, %c0_i32_0 : i32, i32, i32
  }
}

</mosaic_0001>

<bundles_post_ra>
// kernel: tpu_custom_call.1
= control target key start
LH: loop header
LB: loop body
LE: loop exit
PB: predicated region body
PF: predicated region fallthrough
CT: control target
= control target key end

     0   :  { %7 = vsyncpa [#allocation3], 0  ;;  %s785_s0 = inlined_call_operand.hbm [shape: f32[2,4,256], index: 0, kind: input, shape index: {}]   ;;  %s786_s1 = inlined_call_operand.hbm [shape: s32[2,1,256], index: 1, kind: input, shape index: {}]   ;;  %s787_s2 = inlined_call_operand.hbm [shape: f32[2,1,256], index: 2, kind: output, shape index: {}]  }
   0x1   :  { %9 = vsyncpa [#allocation3 + $0x1], 0 }
   0x2   :  { %10 = vsyncpa [#allocation6], 0 }
   0x3   :  { %12 = vsyncpa [#allocation6 + $0x1], 0 }
   0x4   :  { %13 = vsyncpa [#allocation4], 0 }
   0x5   :  { %15 = vsyncpa [#allocation4 + $0x1], 0  ;;  %s592_s9 = smov 0   ;;  %s594_s10 = smov 0  }
   0x6   :  { %s596_s11 = smov 0   ;;  %s598_s12 = smov 0  }
   0x7 LB: > { %s613_s13 = sadd.s32 4294967295, %s571_s12   ;;  %s369_s14 = sadd.s32 4294967294, %s571_s12   ;;  %s571_s12 = sphi %s598_s12, %s806_s12   ;;  %s567_s11 = sphi %s596_s11, %s805_s11   ;;  %s563_s10 = sphi %s594_s10, %s804_s10   ;;  %s559_s9 = sphi %s592_s9, %s803_s9  }
   0x8   : > { %s617_s15 = sadd.s32 1, %s571_s12   ;;  %s28_s16 = sadd.s32 1, %s567_s11 }
   0x9   : > { %s25_s17 = ssub.s32 %s571_s12, %s617_s15  ;;  %p35_p0 = scmp.ne.s32.totalorder %s567_s11, %s563_s10 }
   0xa   : > { %p26_p1 = scmp.eq.s32.totalorder %s25_s17, 0  ;;  %p36_p2 = scmp.eq.s32.totalorder %s571_s12, 0 }
   0xb   : > { %p41_p3 = scmp.ne.s32.totalorder %s563_s10, %s559_s9  ;;  %p42_p4 = scmp.eq.s32.totalorder %s613_s13, 0 }
   0xc   : > { %s629_s18 = scalar_select %p26_p1, %s567_s11, %s28_s16  }
   0xd   : > { %p631_p5 = por %p36_p2, %p35_p0  ;;  %p635_p6 = por %p42_p4, %p41_p3 }
   0xe   : > { %p91_p7 = scmp.eq.s32.totalorder %s613_s13, 1  ;;  %p97_p8 = scmp.eq.s32.totalorder %s369_s14, 1 }
   0xf   : > { %s791_s20 = scalar_select %p635_p6, 1, 0 }
  0x10   : > { %p407_p10 = scmp.lt.s32.totalorder %s571_s12, 2  ;;  %p642_p11 = por %p91_p7, %p35_p0 }
  0x11   : > { %p646_p12 = por %p97_p8, %p41_p3  ;;  %s651_s23 = sand.u32 1, %s567_s11  }
  0x12   : > { %s792_s21 = scalar_select %p642_p11, 1, 0 }
  0x13   : > { %s793_s22 = scalar_select %p646_p12, 1, 0 }
  0x14   : > { %s387_s24 = sshll.u32 %s571_s12, 7  ;;  %s372_s25 = sshll.u32 %s651_s23, 3 }
  0x15   : > { %s658_s28 = scalar_lea.hbm %s785_s0, %s387_s24  ;;  %s121_s29 = scalar_lea.vmem [#allocation2], %s372_s25 }
  0x16   : > { %s129_s30 = sshll.u32 %s121_s29, 4  ;;  %p662_p13 = pnand %p407_p10, %p631_p5  ;;  %s666_s30 = int_to_ptr.vmem [resolvable:$true] %s129_s30 }
  0x17   : > { %s118_s4 = scalar_lea.sflag [#allocation3], %s651_s23  ;;  %s447_s5 = scalar_lea.hbm %s658_s28, 128 }
  0x18   : > { %p448_p2 = scmp.ne.s32.totalorder %s658_s28, %s447_s5  ;;  %p449_p3 = pneg %p662_p13 }
  0x19   : > { %s452_s8 = scalar_lea.hbm %s785_s0, 256  ;;  %p453_p5 = scmp.lt.s32.totalorder %s658_s28, %s785_s0 }
  0x1a   : > { %p450_p4 = pnand %p449_p3, %p448_p2  ;;  %p454_p8 = scmp.lt.s32.totalorder %s452_s8, %s447_s5 }
  0x1c   : > { %p451_p7 = pneg %p450_p4  ;;  %p455_p10 = por %p454_p8, %p453_p5 }
  0x1e   : > { %p456_p9 = pnand %p455_p10, %p451_p7 }
  0x20   : > { %459 = shalt.err (!%p456_p9)
}
  0x21   : > { %s460_s17 = scalar_lea.vmem %s666_s30, 128  ;;  %s573_s19 = smov [#allocation2]  }
  0x22   : > { %p461_p0 = scmp.ne.s32.totalorder %s666_s30, %s460_s17  ;;  %s465_s24 = sshll.u32 %s573_s19, 4  ;;  %s466_s24 = int_to_ptr.vmem [resolvable:$false] %s465_s24 }
  0x23   : > { %s467_s25 = scalar_lea.vmem %s466_s24, 256  ;;  %p468_p1 = scmp.lt.s32.totalorder %s666_s30, %s466_s24 }
  0x24   : > { %p463_p2 = pnand %p461_p0, %p449_p3  ;;  %p469_p12 = scmp.lt.s32.totalorder %s467_s25, %s460_s17 }
  0x26   : > { %p464_p4 = pneg %p463_p2  ;;  %p470_p11 = por %p469_p12, %p468_p1 }
  0x28   : > { %p471_p5 = pnand %p470_p11, %p464_p4 }
  0x2a   : > { %474 = shalt.err (!%p471_p5)
}
  0x2b   : > { %399 = dma.hbm_to_vmem [thread:$0]  (!%p662_p13), %s658_s28, 128, %s666_s30, %s118_s4  }
  0x2c   : > { %p795_p9 = scmp.lt.s32.totalorder %s571_s12, 3  ;;  %p796_p0 = scmp.ge.s32.totalorder %s571_s12, 1 }
  0x2d   : > { %s375_s27 = sshll.u32 %s651_s23, 1  ;;  %s388_s29 = sshll.u32 %s571_s12, 5 }
  0x2e   : > { %p699_p7 = pnand %p796_p0, %p795_p9  ;;  %s708_s7 = scalar_lea.hbm %s786_s1, %s388_s29 }
  0x2f   : > { %s140_s8 = scalar_lea.vmem [#allocation5], %s375_s27  ;;  %s137_s28 = scalar_lea.sflag [#allocation6], %s651_s23 }
  0x30   : > { %s797_s26 = scalar_select %p699_p7, 1, 0 }
  0x31   : > { %s148_s14 = sshll.u32 %s140_s8, 4  ;;  %s475_s30 = scalar_lea.hbm %s708_s7, 32  ;;  %s149_s14 = int_to_ptr.vmem [resolvable:$true] %s148_s14 }
  0x32   : > { %p476_p11 = scmp.ne.s32.totalorder %s708_s7, %s475_s30  ;;  %s480_s17 = scalar_lea.hbm %s786_s1, 64 }
  0x33   : > { %p481_p8 = scmp.lt.s32.totalorder %s708_s7, %s786_s1  ;;  %p482_p10 = scmp.lt.s32.totalorder %s480_s17, %s475_s30 }
  0x34   : > { %p478_p12 = pnand %p476_p11, %p449_p3 }
  0x35   : > { %p483_p2 = por %p482_p10, %p481_p8 }
  0x36   : > { %p479_p1 = pneg %p478_p12 }
  0x38   : > { %p484_p4 = pnand %p483_p2, %p479_p1 }
  0x3a   : > { %487 = shalt.err (!%p484_p4)
}
  0x3b   : > { %s488_s25 = scalar_lea.vmem %s149_s14, 32  ;;  %s574_s23 = smov [#allocation5]  }
  0x3c   : > { %p489_p5 = scmp.ne.s32.totalorder %s149_s14, %s488_s25  ;;  %s493_s27 = sshll.u32 %s574_s23, 4  ;;  %s494_s27 = int_to_ptr.vmem [resolvable:$false] %s493_s27 }
  0x3d   : > { %s495_s29 = scalar_lea.vmem %s494_s27, 64  ;;  %p496_p11 = scmp.lt.s32.totalorder %s149_s14, %s494_s27 }
  0x3e   : > { %p491_p9 = pnand %p489_p5, %p449_p3  ;;  %p497_p12 = scmp.lt.s32.totalorder %s495_s29, %s488_s25 }
  0x40   : > { %p492_p0 = pneg %p491_p9  ;;  %p498_p6 = por %p497_p12, %p496_p11 }
  0x42   : > { %p499_p7 = pnand %p498_p6, %p492_p0 }
  0x44   : > { %502 = shalt.err (!%p499_p7)
}
  0x45   : > { %402 = dma.hbm_to_vmem [thread:$0]  (!%p662_p13), %s708_s7, 32, %s149_s14, %s137_s28  }
  0x46   : > { %p798_p1 = scmp.ne.s32.totalorder %s797_s26, 0 }
  0x47   : > { %s732_s5 = sand.u32 (!%p798_p1), 1, %s563_s10   ;;  %p799_p3 = scmp.ne.s32.totalorder (!%p798_p1), %s791_s20, 0 }
  0x48   : > { %157 = sbr.rel (%p798_p1) target bundleno = 140 (0x8c), region = 28  ;;  %s379_s6 = sshll.u32 (!%p798_p1), %s732_s5, 3 }
  0x49   : > { %s160_s8 = scalar_lea.sflag (!%p798_p1), [#allocation3], %s732_s5  ;;  %s163_s30 = scalar_lea.vmem (!%p798_p1), [#allocation2], %s379_s6 }
  0x4d   : > { %546 = dma.done.wait (%p799_p3), %s160_s8, 128  }
  0x4e   : > { %548 = vsyncadd (%p799_p3), %s160_s8, 4294967168  ;;  %s380_s3 = sshll.u32 %s732_s5, 1  ;;  %s169_s26 = scalar_lea.sflag [#allocation6], %s732_s5 }
  0x4f   : > { %s172_s7 = scalar_lea.vmem [#allocation5], %s380_s3 }
  0x50   : > { %550 = dma.done.wait (%p799_p3), %s169_s26, 32  }
  0x51   : > { %552 = vsyncadd (%p799_p3), %s169_s26, 4294967264  ;;  %v200_v0 = vlaneseq  ;;  %v198_v4 = vld [vmem:[%s163_s30] sm:$0xff]  ;;  %v199_v5 = vld [vmem:[%s172_s7] sm:$0x3]  ;;  %vm217_vm0 = vcmask 1043456   ;;  %s197_s20 = scalar_lea.vmem [#allocation7], %s380_s3 }
  0x52   : > { %v213_v8 = vcombine.high %v198_v4, %v198_v4  ;;  %v575_v25 = vmov 1966171168   ;;  %s276_s14 = sshll.u32 %s197_s20, 4  ;;  %s389_s28 = sshll.u32 %s613_s13, 5  ;;  %s277_s14 = int_to_ptr.vmem [resolvable:$true] %s276_s14 }
  0x53   : > { %v201_v1 = vshrl.u32 %v200_v0, 7  ;;  %v242_v26 = vunpack.c.l.s4 %v575_v25  ;;  %vm258_vm3 = vcmp.lt.s32.totalorder %v200_v0, 256  ;;  %s274_s17 = scalar_lea.hbm %s787_s2, %s389_s28  ;;  %s262_s19 = scalar_lea.sflag [#allocation4], %s732_s5 }
  0x54   : > { %s503_s24 = scalar_lea.vmem %s277_s14, 32  ;;  %p800_p13 = scmp.ne.s32.totalorder %s792_s21, 0 }
  0x55   : > { %v204_v2 = vsub.s32 0, %v201_v1  ;;  %v208_v3 = vsub.s32 1, %v201_v1  ;;  %v243_v27 = vunpack.c.0.s8 %v242_v26  ;;  %p504_p6 = scmp.ne.s32.totalorder %s277_s14, %s503_s24  ;;  %s576_s25 = smov [#allocation7]  }
  0x56   : > { %s507_s23 = sshll.u32 %s576_s25, 4  ;;  %s508_s23 = int_to_ptr.vmem [resolvable:$false] %s507_s23 }
  0x57   : > { %v205_v6 = vrot.slane %v199_v5, %v204_v2  ;;  %v209_v7 = vrot.slane %v199_v5, %v208_v3  ;;  %v246_v32 = vsub.s32 %v243_v27, %v201_v1  ;;  %p505_p7 = pnand %p504_p6, %p800_p13  ;;  %s509_s27 = scalar_lea.vmem %s508_s23, 64 }
  0x58   : > { %p510_p10 = scmp.lt.s32.totalorder %s277_s14, %s508_s23  ;;  %p511_p2 = scmp.lt.s32.totalorder %s509_s27, %s503_s24 }
  0x59   : > { %vm210_vm1 = vcmp.eq.s32.totalorder %v201_v1, %v205_v6  ;;  %vm211_vm2 = vcmp.eq.s32.totalorder %v201_v1, %v209_v7  ;;  %p506_p8 = pneg %p505_p7 }
  0x5a   : > { %v215_v9 = vsel %vm210_vm1, %v198_v4, 0.0  ;;  %v216_v10 = vsel %vm211_vm2, %v213_v8, 0.0  ;;  %p512_p4 = por %p511_p2, %p510_p10 }
  0x5b   : > { %v218_v11 = vsel %vm217_vm0, %v215_v9, 0.0  ;;  %v225_v12 = vsel %vm217_vm0, %v216_v10, 0.0 }
  0x5c   : > { %v219_v13 = vrot.slane %v218_v11, 4  ;;  %v226_v14 = vrot.slane %v225_v12, 4  ;;  %p513_p5 = pnand %p512_p4, %p506_p8 }
  0x5e   : > { %v220_v15 = vadd.f32 %v219_v13, %v218_v11  ;;  %v227_v16 = vadd.f32 %v226_v14, %v225_v12 }
  0x60   : > { %v221_v17 = vrot.slane %v220_v15, 2  ;;  %v228_v18 = vrot.slane %v227_v16, 2 }
  0x62   : > { %v222_v19 = vadd.f32 %v221_v17, %v220_v15  ;;  %v229_v20 = vadd.f32 %v228_v18, %v227_v16 }
  0x64   : > { %v223_v21 = vrot.slane %v222_v19, 1  ;;  %v230_v22 = vrot.slane %v229_v20, 1 }
  0x66   : > { %v224_v23 = vadd.f32 %v223_v21, %v222_v19  ;;  %v231_v24 = vadd.f32 %v230_v22, %v229_v20 }
  0x68   : > { %443 = vlog2.f32 %v224_v23 }
  0x69   : > { %445 = vlog2.f32 %v231_v24 }
  0x75   : > { %v444_v28 = vpop.eup %443 }
  0x76   : > { %v446_v29 = vpop.eup %445  ;;  %v233_v30 = vmul.f32 0.6931472, %v444_v28 }
  0x77   : > { %v235_v31 = vmul.f32 0.6931472, %v446_v29 }
  0x79   : > { %v240_v33 = vcombine.low %v233_v30, %v235_v31 }
  0x7b   : > { %v247_v34 = vrot.slane %v240_v33, %v246_v32 }
  0x7d   : > { %v254_v35 = vrot.slane %v247_v34, %v246_v32 }
  0x7f   : > { %260 = vst.msk [vmem:[%s197_s20] sm:$0x3] %vm258_vm3, %v254_v35 }
  0x80   : > { %516 = shalt.err (!%p513_p5)
}
  0x81   : > { %s517_s13 = scalar_lea.hbm %s274_s17, 32  ;;  %s521_s6 = scalar_lea.hbm %s787_s2, 64 }
  0x82   : > { %p518_p9 = scmp.ne.s32.totalorder %s274_s17, %s517_s13  ;;  %p522_p12 = scmp.lt.s32.totalorder %s274_s17, %s787_s2 }
  0x83   : > { %p523_p1 = scmp.lt.s32.totalorder %s521_s6, %s517_s13 }
  0x84   : > { %p519_p0 = pnand %p518_p9, %p800_p13 }
  0x85   : > { %p524_p3 = por %p523_p1, %p522_p12 }
  0x86   : > { %p520_p11 = pneg %p519_p0 }
  0x88   : > { %p525_p6 = pnand %p524_p3, %p520_p11 }
  0x8a   : > { %528 = shalt.err (!%p525_p6)
}
  0x8b   : > { %394 = dma.vmem_to_hbm [thread:$0]  (%p800_p13), %s277_s14, 32, %s274_s17, %s262_s19  }
  0x8c PF: > { %s288_s3 = sand.u32 1, %s559_s9   ;;  %p801_p7 = scmp.ne.s32.totalorder %s793_s22, 0 }
  0x8d   : > { %p802_p8 = scmp.ge.s32.totalorder %s571_s12, 2  ;;  %s289_s26 = scalar_lea.sflag [#allocation4], %s288_s3 }
  0x8f   : > { %p404_p10 = pnand %p802_p8, %p801_p7 }
  0x91   : > { %p405_p2 = pneg %p404_p10 }
  0x93   : > { %554 = dma.done.wait (%p405_p2), %s289_s26, 32  }
  0x94   : > { %556 = vsyncadd (%p405_p2), %s289_s26, 4294967264  ;;  %p18_p4 = scmp.ge.s32.totalorder %s617_s15, 4   ;;  %s803_s9 = smov %s563_s10 }
  0x95   : > { %s804_s10 = smov %s567_s11  ;;  %s805_s11 = smov %s629_s18 }
  0x96   : > { %s806_s12 = smov %s617_s15  ;;  %20 = sbr.rel (!%p18_p4) target bundleno = 7 (0x7), region = 86 }
  0x9b   :  { %294 = vsyncpa [#allocation3], 1 }
  0x9c   :  { %296 = vsyncpa [#allocation3 + $0x1], 1 }
  0x9d   :  { %297 = vsyncpa [#allocation6], 1 }
  0x9e   :  { %299 = vsyncpa [#allocation6 + $0x1], 1 }
  0x9f   :  { %300 = vsyncpa [#allocation4], 1 }
  0xa0   :  { %302 = vsyncpa [#allocation4 + $0x1], 1 }

</bundles_post_ra>
